<compile_context>
chip_gen: v6e
topology: v6e:2x2x1
jax: 0.10.0
libtpu: 0.0.40
codegen_flags: <defaults>
</compile_context>

<pallas_src>
import math

import jax
import jax.numpy as jnp
from jax.experimental import pallas as pl
from jax.experimental.pallas import tpu as pltpu


def _copy_kernel(x_ref, o_ref):
    # Plain lane-dense 2D tile copy; the flatten happened (for free) in the
    # wrapper's reshape, so no in-kernel relayout is needed.
    o_ref[...] = x_ref[...]


_LANE = 128
_SPLIT_THRESHOLD_BYTES = 4 * 1024 * 1024   # force >=2 row tiles above this (v7x dual-TC)
_HARD_TILE_CAP_BYTES = 12 * 1024 * 1024    # never emit a single tile bigger than this


def _chip_params():
    """Per-chip (per-tile byte budget, requested scoped-VMEM limit)."""
    try:
        vmem = int(getattr(pltpu.get_tpu_info(), "vmem_capacity_bytes"))
    except Exception:
        vmem = None
    if vmem is not None and vmem <= (64 << 20):
        # v7x: 64 MiB physical VMEM / TC.  4 live double-buffered tiles
        # (in + out) * 6 MiB = 24 MiB; request 44 MiB scoped for headroom.
        return 6 << 20, 44 << 20
    if vmem is not None:
        # v5e / v6e: 128 MiB physical VMEM.  4 * 4 MiB = 16 MiB of buffers;
        # a 48 MiB scoped limit is safely under physical on both chips.
        return 4 << 20, 48 << 20
    # Unknown backend (e.g. interpret mode): stay under every default limit.
    return 2 << 20, None


def _pick_slab(total):
    """Largest lane-dense factorization total -> (rows, cols), cols % 128 == 0."""
    for cols in (2048, 1024, 512, 256, 128):
        if total % cols == 0:
            return total // cols, cols
    return None


def _pick_tile(dim: int, unit: int, max_tile: int) -> int:
    """Largest multiple of `unit` dividing `dim` and <= max_tile, else `dim`."""
    best = None
    t = unit
    cap = min(dim, max_tile)
    while t <= cap:
        if dim % t == 0:
            best = t
        t += unit
    return best if best is not None else dim


def flatten(x: jax.Array) -> jax.Array:
    """Pallas equivalent of Flatten.forward: (N, ...) -> (N, prod(rest))."""
    n = x.shape[0] if x.ndim >= 1 else 1
    d = math.prod(x.shape[1:]) if x.ndim > 1 else 1

    # Metadata-only flatten (== torch .contiguous().view(N, -1) on a
    # C-contiguous tensor).  Everything below is just a tiled HBM copy.
    x2 = jnp.reshape(x, (n, d))
    if n == 0 or d == 0:
        return x2

    itemsize = jnp.dtype(x.dtype).itemsize
    total = n * d
    total_bytes = total * itemsize
    tile_budget, vmem_limit = _chip_params()

    slab = _pick_slab(total)
    if slab is None:
        # total not a multiple of 128: tiny/awkward shapes.  Single-block copy
        # if it fits comfortably, otherwise the honest metadata-only reshape.
        if total_bytes > _HARD_TILE_CAP_BYTES:
            # TODO(synk): huge non-multiple-of-128 flats fall back to the
            # metadata-only reshape instead of a lane-sparse Pallas copy.
            return x2
        rows, cols, tr, tc = n, d, n, d          # full-extent block is legal
    else:
        rows, cols = slab
        tc = cols                                # lane-dense, multiple of 128
        # dtype-aware sublane packing: 8 (f32), 16 (bf16), 32 (int8/fp8)
        sublane_unit = 8 * max(1, 4 // itemsize)
        max_rows = max(sublane_unit, tile_budget // max(1, tc * itemsize))
        if total_bytes >= _SPLIT_THRESHOLD_BYTES:
            # Keep >= 2 row tiles so v7x's two TensorCores both get DMA work.
            max_rows = min(max_rows, max(sublane_unit, rows // 2))
        tr = _pick_tile(rows, sublane_unit, max_rows)

    if tr * tc * itemsize > _HARD_TILE_CAP_BYTES:
        # Pathological factorization (e.g. large prime row count): don't risk
        # a scoped-VMEM compile failure, the reshape alone is already correct.
        return x2

    x_slab = jnp.reshape(x2, (rows, cols))       # metadata-only

    out_slab = pl.pallas_call(
        _copy_kernel,
        out_shape=jax.ShapeDtypeStruct((rows, cols), x.dtype),
        grid_spec=pltpu.PrefetchScalarGridSpec(
            num_scalar_prefetch=0,
            grid=(rows // tr,),
            in_specs=[pl.BlockSpec((tr, tc), lambda i: (i, 0))],
            out_specs=pl.BlockSpec((tr, tc), lambda i: (i, 0)),
        ),
        compiler_params=pltpu.CompilerParams(
            # Every grid step writes a distinct output tile -> safe to shard
            # across TensorCores (megacore / v7x dual-TC).
            dimension_semantics=("parallel",),
            vmem_limit_bytes=vmem_limit,
        ),
        cost_estimate=pl.CostEstimate(
            flops=0, transcendentals=0, bytes_accessed=2 * total_bytes),
        # Shapes/dtypes match: output may reuse the input HBM buffer when the
        # caller donates it under jit (no second N*D allocation).
        input_output_aliases={0: 0},
    )(x_slab)

    return jnp.reshape(out_slab, (n, d))         # metadata-only


if __name__ == "__main__":
    key = jax.random.PRNGKey(0)
    # Small NCHW input consistent with a conv-feature-map input to Flatten.
    x = jax.random.normal(key, (2, 4, 16, 16), dtype=jnp.float32)

    y = jax.block_until_ready(flatten(x))

    # Reference: plain row-major reshape (== torch .contiguous().view(N, -1)).
    y_ref = x.reshape(x.shape[0], -1)
    assert y.shape == (2, 4 * 16 * 16), y.shape
    assert jnp.array_equal(y, y_ref), "Pallas flatten mismatch vs reference"

    print("KERNEL_OK")
</pallas_src>

<mosaic_0001>
module attributes {stable_mosaic.version = 11 : i64} {
  func.func @_copy_kernel(%arg0: i32, %arg1: memref<1x2048xf32, #tpu.memory_space<vmem>>, %arg2: memref<1x2048xf32, #tpu.memory_space<vmem>>) attributes {dimension_semantics = [#tpu.dimension_semantics<parallel>], iteration_bounds = array<i64: 1>, scalar_prefetch = 0 : i64, scratch_operands = 0 : i64, tpu.core_type = #tpu.core_type<tc>, window_params = [{transform_indices = @transform_0, window_bounds = array<i64: 1, 2048>}, {transform_indices = @transform_1, window_bounds = array<i64: 1, 2048>}]} {
    %c0 = arith.constant 0 : index
    %c0_0 = arith.constant 0 : index
    %0 = vector.load %arg1[%c0, %c0_0] : memref<1x2048xf32, #tpu.memory_space<vmem>>, vector<1x2048xf32>
    %c0_1 = arith.constant 0 : index
    %c0_2 = arith.constant 0 : index
    %1 = vector.load %arg2[%c0_1, %c0_2] : memref<1x2048xf32, #tpu.memory_space<vmem>>, vector<1x2048xf32>
    tpu.vector_store %arg2[%c0_1, %c0_2], %0 {strides = array<i32>} : memref<1x2048xf32, #tpu.memory_space<vmem>>, vector<1x2048xf32>,
    return
  }
  func.func @transform_0(%arg0: i32) -> (i32, i32) {
    %c0_i32 = arith.constant 0 : i32
    %c0_i32_0 = arith.constant 0 : i32
    return %arg0, %c0_i32 : i32, i32
  }
  func.func @transform_1(%arg0: i32) -> (i32, i32) {
    %c0_i32 = arith.constant 0 : i32
    %c0_i32_0 = arith.constant 0 : i32
    return %arg0, %c0_i32 : i32, i32
  }
}

</mosaic_0001>

<bundles_post_ra>
// kernel: tpu_custom_call.1
= control target key start
LH: loop header
LB: loop body
LE: loop exit
PB: predicated region body
PF: predicated region fallthrough
CT: control target
= control target key end

     0   :  { %6 = vsyncpa [#allocation3], 0  ;;  %s104_s0 = inlined_call_operand.hbm [shape: f32[1,2048], index: 0, kind: input, shape index: {}, may-alias: {0,1}]   ;;  %s105_s1 = inlined_call_operand.hbm [shape: f32[1,2048], index: 1, kind: output, shape index: {}, may-alias: {0,1}]  }
   0x1   :  { %7 = vsyncpa [#allocation4], 0  ;;  %s86_s6 = smov [#allocation2]  }
   0x2   :  { %s14_s7 = sshll.u32 %s86_s6, 4  ;;  %s15_s7 = int_to_ptr.vmem [resolvable:$true] %s14_s7 }
   0x3   :  { %s50_s8 = scalar_lea.vmem %s15_s7, 256  ;;  %p55_p1 = scmp.lt.s32.totalorder %s15_s7, %s15_s7 }
   0x4   :  { %p51_p0 = scmp.ne.s32.totalorder %s15_s7, %s50_s8  ;;  %p56_p2 = scmp.lt.s32.totalorder %s50_s8, %s50_s8 }
   0x6   :  { %p57_p3 = por %p56_p2, %p55_p1 }
   0x8   :  { %p58_p4 = pnand %p57_p3, %p51_p0 }
   0xa   :  { %61 = shalt.err (!%p58_p4)
}
   0xb   :  { %17 = dma.hbm_to_vmem [thread:$0]  %s104_s0, 256, %s15_s7, [#allocation3]  }
   0xc   :  { %82 = dma.done.wait [#allocation3], 256  }
   0xd   :  { %83 = vsyncadd [#allocation3], 4294967040  ;;  %s87_s11 = smov [#allocation5]   ;;  %v21_v0 = vld [vmem:[#allocation2] sm:$0xff]  ;;  %v22_v1 = vld [vmem:[#allocation2 + $0x8] sm:$0xff] }
   0xe   :  { %s31_s12 = sshll.u32 %s87_s11, 4  ;;  %23 = vst [vmem:[#allocation5] sm:$0xff] %v21_v0  ;;  %24 = vst [vmem:[#allocation5 + $0x8] sm:$0xff] %v22_v1  ;;  %s32_s12 = int_to_ptr.vmem [resolvable:$true] %s31_s12 }
   0xf   :  { %s62_s13 = scalar_lea.vmem %s32_s12, 256  ;;  %p67_p6 = scmp.lt.s32.totalorder %s32_s12, %s32_s12 }
  0x10   :  { %p63_p5 = scmp.ne.s32.totalorder %s32_s12, %s62_s13  ;;  %p68_p7 = scmp.lt.s32.totalorder %s62_s13, %s62_s13 }
  0x12   :  { %p69_p8 = por %p68_p7, %p67_p6 }
  0x14   :  { %p70_p9 = pnand %p69_p8, %p63_p5 }
  0x16   :  { %73 = shalt.err (!%p70_p9)
}
  0x17   :  { %34 = dma.vmem_to_hbm [thread:$0]  %s32_s12, 256, %s105_s1, [#allocation4]  }
  0x18   :  { %84 = dma.done.wait [#allocation4], 256  }
  0x19   :  { %85 = vsyncadd [#allocation4], 4294967040 }
  0x1a   :  { %38 = vsyncpa [#allocation3], 1 }
  0x1b   :  { %39 = vsyncpa [#allocation4], 1 }

</bundles_post_ra>
